<compile_context>
chip_gen: v7x
topology: tpu7x:2x2x1
jax: 0.10.0
libtpu: 0.0.40
codegen_flags: <defaults>
</compile_context>

<pallas_src>
import jax
import jax.numpy as jnp
from jax.experimental import pallas as pl
from jax.experimental.pallas import tpu as pltpu

_EPS = 1e-12  # matches torch.nn.functional.normalize default eps


def _channel_rmsnorm_kernel(x_ref, g_ref, o_ref):
    # x_ref: (1, C, TILE_HW)   g_ref: (C, 1) f32 (sqrt(C) pre-folded)   o_ref: (1, C, TILE_HW)
    x = x_ref[...]
    xf = x.astype(jnp.float32)
    # Sum of squares over the channel axis, per spatial position (per-lane).
    sumsq = jnp.sum(xf * xf, axis=1, keepdims=True)          # (1, 1, TILE_HW)
    # max(sqrt(s), eps) == sqrt(max(s, eps^2)); rsqrt runs on the EUP slot.
    inv = jax.lax.rsqrt(jnp.maximum(sumsq, _EPS * _EPS))      # (1, 1, TILE_HW)
    g = g_ref[...]                                            # (C, 1), sqrt(C) folded in
    out = (xf * inv) * g[None, :, :]
    o_ref[...] = out.astype(o_ref.dtype)


def _pick_tile_hw(n, c, hw, itemsize, target_block_bytes=2 << 20, min_total_steps=4):
    """Lane-dense spatial tile.

    Byte-capped (~2 MiB input block), multiple of 128, never larger than the
    largest 128-multiple <= HW (ragged remainder handled by Pallas masking),
    and shrunk if needed so the grid has enough steps for multi-core chips.
    """
    if hw <= 128:
        # Block equals the full (small) spatial dim — allowed by the tiling rule.
        return hw
    tile = (target_block_bytes // max(1, c * itemsize)) // 128 * 128
    tile = max(128, tile)
    tile = min(tile, (hw // 128) * 128)
    # Keep >= min_total_steps grid steps (v7x has 2 TCs), but never drop below 128 lanes.
    while n * pl.cdiv(hw, tile) < min_total_steps and tile > 128:
        tile = max(128, (tile // 2) // 128 * 128)
    return tile


def channel_rmsnorm(x, gamma):
    """x: (N, C, H, W) NCHW; gamma: (C,), (C,1) or (C,1,1). Returns (N, C, H, W)."""
    n, c, h, w = x.shape
    hw = h * w
    itemsize = jnp.dtype(x.dtype).itemsize

    # Fold sqrt(C) into gamma once (C elements; negligible wrapper cost).
    scale = float(c) ** 0.5
    gamma2d = (jnp.reshape(gamma, (c, 1)).astype(jnp.float32)) * scale

    tile_hw = _pick_tile_hw(n, c, hw, itemsize)
    hw_blocks = pl.cdiv(hw, tile_hw)

    x3 = jnp.reshape(x, (n, c, hw))  # no padding; ragged last block is masked

    # VMEM budget: double-buffered in + out blocks, f32 temporaries (xf, out),
    # gamma, plus headroom.  Clamp to [8 MiB, 48 MiB]: safe on v7x (64 MiB
    # physical) and well within v5e/v6e (128 MiB physical).
    block_bytes = c * tile_hw * itemsize
    f32_temp_bytes = 2 * c * tile_hw * 4 + 2 * tile_hw * 4
    needed = 2 * (2 * block_bytes) + f32_temp_bytes + c * 128 * 4 + (2 << 20)
    vmem_limit = int(min(48 * 1024 * 1024, max(needed, 8 * 1024 * 1024)))

    cost = pl.CostEstimate(
        flops=int(4 * n * c * hw),
        transcendentals=int(n * hw),
        bytes_accessed=int(2 * n * c * hw * itemsize + c * 4),
    )

    out3 = pl.pallas_call(
        _channel_rmsnorm_kernel,
        out_shape=jax.ShapeDtypeStruct((n, c, hw), x.dtype),
        grid_spec=pltpu.PrefetchScalarGridSpec(
            num_scalar_prefetch=0,
            grid=(n, hw_blocks),
            in_specs=[
                pl.BlockSpec((1, c, tile_hw), lambda i, j: (i, 0, j)),  # x tile
                pl.BlockSpec((c, 1), lambda i, j: (0, 0)),              # gamma, resident
            ],
            out_specs=pl.BlockSpec((1, c, tile_hw), lambda i, j: (i, 0, j)),
        ),
        compiler_params=pltpu.CompilerParams(
            dimension_semantics=("parallel", "parallel"),
            vmem_limit_bytes=vmem_limit,
        ),
        cost_estimate=cost,
    )(x3, gamma2d)

    return jnp.reshape(out3, (n, c, h, w))


def _reference(x, gamma):
    # Pure-JAX reference mirroring the PyTorch forward.
    c = x.shape[1]
    norm = jnp.sqrt(jnp.sum(x.astype(jnp.float32) ** 2, axis=1, keepdims=True))
    normed = x.astype(jnp.float32) / jnp.maximum(norm, _EPS)
    g = jnp.reshape(gamma, (1, c, 1, 1)).astype(jnp.float32)
    return normed * (c ** 0.5) * g


if __name__ == "__main__":
    key = jax.random.PRNGKey(0)

    # Primary case: matches the module's expected small NCHW input.
    N, C, H, W = 2, 4, 16, 16
    x = jax.random.normal(key, (N, C, H, W), dtype=jnp.float32)
    gamma = jnp.ones((C, 1, 1), dtype=jnp.float32)  # nn.Parameter(torch.ones(dim,1,1))

    out = channel_rmsnorm(x, gamma)
    out = jax.block_until_ready(out)
    ref = _reference(x, gamma)
    assert out.shape == (N, C, H, W)
    assert jnp.allclose(out, ref, atol=1e-5, rtol=1e-5), "mismatch vs reference (main)"

    # Secondary case: HW not a multiple of 128 — exercises the masked ragged
    # last block (no wrapper padding / slicing involved).
    key2 = jax.random.PRNGKey(0)
    x2 = jax.random.normal(key2, (1, 4, 13, 13), dtype=jnp.float32)
    gamma2 = jnp.ones((4, 1, 1), dtype=jnp.float32)
    out2 = jax.block_until_ready(channel_rmsnorm(x2, gamma2))
    ref2 = _reference(x2, gamma2)
    assert jnp.allclose(out2, ref2, atol=1e-5, rtol=1e-5), "mismatch vs reference (ragged)"

    print("KERNEL_OK")
</pallas_src>

<mosaic_0001>
module attributes {stable_mosaic.version = 11 : i64} {
  func.func @_channel_rmsnorm_kernel(%arg0: i32, %arg1: i32, %arg2: memref<1x4x128xf32, #tpu.memory_space<vmem>>, %arg3: memref<4x1xf32, #tpu.memory_space<vmem>>, %arg4: memref<1x4x128xf32, #tpu.memory_space<vmem>>) attributes {dimension_semantics = [#tpu.dimension_semantics<parallel>, #tpu.dimension_semantics<parallel>], iteration_bounds = array<i64: 2, 2>, scalar_prefetch = 0 : i64, scratch_operands = 0 : i64, tpu.core_type = #tpu.core_type<tc>, window_params = [{transform_indices = @transform_0, window_bounds = array<i64: 1, 4, 128>}, {pipeline_mode = #tpu.pipeline_mode<synchronous>, transform_indices = @transform_1, window_bounds = array<i64: 4, 1>}, {transform_indices = @transform_2, window_bounds = array<i64: 1, 4, 128>}]} {
    %c0 = arith.constant 0 : index
    %c0_0 = arith.constant 0 : index
    %c0_1 = arith.constant 0 : index
    %0 = vector.load %arg2[%c0, %c0_0, %c0_1] : memref<1x4x128xf32, #tpu.memory_space<vmem>>, vector<1x4x128xf32>
    %1 = arith.mulf %0, %0 : vector<1x4x128xf32>
    %cst = arith.constant dense<0.000000e+00> : vector<1x128xf32>
    %2 = vector.multi_reduction <add>, %1, %cst [1] : vector<1x4x128xf32> to vector<1x128xf32>
    %3 = vector.shape_cast %2 : vector<1x128xf32> to vector<1x1x128xf32>
    %cst_2 = arith.constant 1.000000e-24 : f32
    %4 = vector.broadcast %cst_2 : f32 to vector<1x1x128xf32>
    %5 = arith.maximumf %3, %4 : vector<1x1x128xf32>
    %6 = math.rsqrt %5 : vector<1x1x128xf32>
    %c0_3 = arith.constant 0 : index
    %c0_4 = arith.constant 0 : index
    %7 = vector.load %arg3[%c0_3, %c0_4] : memref<4x1xf32, #tpu.memory_space<vmem>>, vector<4x1xf32>
    %8 = vector.broadcast %6 : vector<1x1x128xf32> to vector<1x4x128xf32>
    %9 = arith.mulf %0, %8 : vector<1x4x128xf32>
    %10 = vector.shape_cast %7 : vector<4x1xf32> to vector<1x4x1xf32>
    %11 = vector.broadcast %10 : vector<1x4x1xf32> to vector<1x4x128xf32>
    %12 = arith.mulf %9, %11 : vector<1x4x128xf32>
    %c0_5 = arith.constant 0 : index
    %c0_6 = arith.constant 0 : index
    %c0_7 = arith.constant 0 : index
    %13 = vector.load %arg4[%c0_5, %c0_6, %c0_7] : memref<1x4x128xf32, #tpu.memory_space<vmem>>, vector<1x4x128xf32>
    tpu.vector_store %arg4[%c0_5, %c0_6, %c0_7], %12 {strides = array<i32>} : memref<1x4x128xf32, #tpu.memory_space<vmem>>, vector<1x4x128xf32>,
    return
  }
  func.func @transform_0(%arg0: i32, %arg1: i32) -> (i32, i32, i32) {
    %c0_i32 = arith.constant 0 : i32
    %c0_i32_0 = arith.constant 0 : i32
    return %arg0, %c0_i32, %arg1 : i32, i32, i32
  }
  func.func @transform_1(%arg0: i32, %arg1: i32) -> (i32, i32) {
    %c0_i32 = arith.constant 0 : i32
    %c0_i32_0 = arith.constant 0 : i32
    %c0_i32_1 = arith.constant 0 : i32
    return %c0_i32, %c0_i32_0 : i32, i32
  }
  func.func @transform_2(%arg0: i32, %arg1: i32) -> (i32, i32, i32) {
    %c0_i32 = arith.constant 0 : i32
    %c0_i32_0 = arith.constant 0 : i32
    return %arg0, %c0_i32, %arg1 : i32, i32, i32
  }
}

</mosaic_0001>

<bundles_post_ra>
// kernel: tpu_custom_call.1
= control target key start
LH: loop header
LB: loop body
LE: loop exit
PB: predicated region body
PF: predicated region fallthrough
CT: control target
= control target key end

     0   :  { %7 = vsyncpa [#allocation3], 0  ;;  %s741_s0 = inlined_call_operand.hbm [shape: f32[2,4,256], index: 0, kind: input, shape index: {}]   ;;  %s742_s1 = inlined_call_operand.vmem [shape: f32[4,1], index: 1, kind: input, shape index: {}]   ;;  %s743_s2 = inlined_call_operand.hbm [shape: f32[2,4,256], index: 2, kind: output, shape index: {}]  }
   0x1   :  { %9 = vsyncpa [#allocation3 + $0x1], 0 }
   0x2   :  { %10 = vsyncpa [#allocation4], 0 }
   0x3   :  { %12 = vsyncpa [#allocation4 + $0x1], 0  ;;  %s544_s9 = smov 0   ;;  %s546_s10 = smov 0  }
   0x4   :  { %s548_s11 = smov 0   ;;  %s550_s12 = smov 0  }
   0x5   :  { %s552_s13 = smov 0   ;;  %s554_s14 = smov 0  }
   0x6   :  { %s556_s15 = smov 0   ;;  %s558_s16 = smov 0  }
   0x7 LB: > { %s299_s17 = sadd.s32 4294967295, %s524_s16   ;;  %s300_s18 = sadd.s32 4294967294, %s524_s16   ;;  %s524_s16 = sphi %s558_s16, %s18_s16   ;;  %s520_s15 = sphi %s556_s15, %s760_s15   ;;  %s516_s14 = sphi %s554_s14, %s759_s14   ;;  %s512_s13 = sphi %s552_s13, %s758_s13   ;;  %s508_s12 = sphi %s550_s12, %s757_s12   ;;  %s504_s11 = sphi %s548_s11, %s756_s11   ;;  %s500_s10 = sphi %s546_s10, %s755_s10   ;;  %s496_s9 = sphi %s544_s9, %s754_s9  }
   0x8   : > { %s27_s19 = sadd.s32 1, %s516_s14  ;;  %s30_s20 = sadd.s32 1, %s520_s15 }
   0x9   : > { %p28_p0 = scmp.ge.s32.totalorder %s27_s19, 2  ;;  %s39_s21 = sadd.s32 1, %s504_s11 }
   0xa   : > { %p46_p1 = scmp.ne.s32.totalorder %s504_s11, %s500_s10  ;;  %p47_p2 = scmp.eq.s32.totalorder %s524_s16, 0 }
   0xb   : > { %s762_s19 = smov (%p28_p0, %s27_s19), 0  ;;  %s764_s20 = smov (!%p28_p0, %s30_s20), %s520_s15 }
   0xc   : > { %s35_s22 = ssub.s32 %s516_s14, %s762_s19  ;;  %p597_p3 = por %p47_p2, %p46_p1 }
   0xd   : > { %p32_p4 = scmp.ge.s32.totalorder %s764_s20, 2  ;;  %p52_p5 = scmp.ne.s32.totalorder %s500_s10, %s496_s9 }
   0xe   : > { %p53_p6 = scmp.eq.s32.totalorder %s299_s17, 0  ;;  %p99_p7 = scmp.eq.s32.totalorder %s299_s17, 3 }
   0xf   : > { %s766_s20 = smov (%p32_p4, %s764_s20), 0  ;;  %p105_p10 = scmp.eq.s32.totalorder %s300_s18, 3 }
  0x10   : > { %p605_p8 = por %p53_p6, %p52_p5  ;;  %p609_p9 = por %p99_p7, %p46_p1 }
  0x11   : > { %s34_s26 = ssub.s32 %s520_s15, %s766_s20  ;;  %p615_p12 = por %p105_p10, %p52_p5 }
  0x12   : > { %s747_s25 = scalar_select %p609_p9, 1, 0 }
  0x13   : > { %s36_s27 = sor.u32 %s35_s22, %s34_s26  ;;  %p326_p13 = scmp.lt.s32.totalorder %s524_s16, 4 }
  0x14   : > { %p37_p11 = scmp.eq.s32.totalorder %s36_s27, 0  ;;  %s128_s29 = sand.u32 1, %s504_s11  }
  0x15   : > { %s748_s28 = scalar_select %p615_p12, 1, 0 }
  0x16   : > { %s622_s30 = scalar_select %p37_p11, %s504_s11, %s39_s21  }
  0x17   : > { %s303_s3 = sshll.u32 %s128_s29, 2  ;;  %s304_s4 = sshll.u32 %s520_s15, 1 }
  0x18   : > { %s137_s5 = sadd.s32 %s516_s14, %s304_s4  ;;  %s132_s6 = scalar_lea.vmem [#allocation2], %s303_s3 }
  0x19   : > { %s141_s7 = sshll.u32 %s132_s6, 4  ;;  %s305_s8 = sshll.u32 %s137_s5, 6  ;;  %s626_s7 = int_to_ptr.vmem [resolvable:$true] %s141_s7 }
  0x1a   : > { %s631_s22 = scalar_lea.hbm %s741_s0, %s305_s8  ;;  %p635_p0 = pnand %p326_p13, %p597_p3 }
  0x1b   : > { %s129_s26 = scalar_lea.sflag [#allocation3], %s128_s29  ;;  %s396_s27 = scalar_lea.hbm %s631_s22, 64 }
  0x1c   : > { %p397_p4 = scmp.ne.s32.totalorder %s631_s22, %s396_s27  ;;  %p398_p5 = pneg %p635_p0 }
  0x1d   : > { %s401_s4 = scalar_lea.hbm %s741_s0, 256  ;;  %p402_p3 = scmp.lt.u32.totalorder %s631_s22, %s741_s0 }
  0x1e   : > { %p399_p6 = pnand %p398_p5, %p397_p4  ;;  %p403_p10 = scmp.lt.u32.totalorder %s401_s4, %s396_s27 }
  0x1f   : > { %p405_p13 = scmp.lt.u32.totalorder %s396_s27, %s631_s22 }
  0x20   : > { %p400_p7 = pneg %p399_p6  ;;  %p404_p11 = por %p403_p10, %p402_p3 }
  0x22   : > { %p406_p1 = por %p405_p13, %p404_p11 }
  0x24   : > { %p407_p2 = pnand %p406_p1, %p400_p7 }
  0x26   : > { %410 = shalt.err (!%p407_p2)
}
  0x27   : > { %s411_s29 = scalar_lea.vmem %s626_s7, 64  ;;  %s526_s8 = smov [#allocation2]  }
  0x28   : > { %p412_p4 = scmp.ne.s32.totalorder %s626_s7, %s411_s29  ;;  %s416_s17 = sshll.u32 %s526_s8, 4  ;;  %s417_s17 = int_to_ptr.vmem [resolvable:$false] %s416_s17 }
  0x29   : > { %s418_s18 = scalar_lea.vmem %s417_s17, 128  ;;  %p419_p9 = scmp.lt.s32.totalorder %s626_s7, %s417_s17 }
  0x2a   : > { %p414_p6 = pnand %p412_p4, %p398_p5  ;;  %p420_p3 = scmp.lt.s32.totalorder %s418_s18, %s411_s29 }
  0x2c   : > { %p415_p12 = pneg %p414_p6  ;;  %p421_p10 = por %p420_p3, %p419_p9 }
  0x2e   : > { %p422_p11 = pnand %p421_p10, %p415_p12 }
  0x30   : > { %425 = shalt.err (!%p422_p11)
}
  0x31   : > { %321 = dma.hbm_to_vmem [thread:$0]  (!%p635_p0), %s631_s22, 64, %s626_s7, %s129_s26  }
  0x32   : > { %p750_p1 = scmp.lt.s32.totalorder %s524_s16, 5  ;;  %p751_p2 = scmp.ge.s32.totalorder %s524_s16, 1 }
  0x34   : > { %p147_p5 = pnand %p751_p2, %p750_p1 }
  0x35   : > { %s671_s27 = sand.u32 (!%p147_p5), 1, %s500_s10  }
  0x36   : > { %150 = sbr.rel (%p147_p5) target bundleno = 208 (0xd0), region = 28  ;;  %s307_s23 = sshll.u32 (!%p147_p5), %s671_s27, 2 }
  0x37   : > { %s153_s3 = scalar_lea.sflag (!%p147_p5), [#allocation3], %s671_s27  ;;  %s156_s4 = scalar_lea.vmem (!%p147_p5), [#allocation2], %s307_s23 }
  0x3d   : > { %487 = dma.done.wait (%p605_p8), %s153_s3, 64  }
  0x3e   : > { %489 = vsyncadd (%p605_p8), %s153_s3, 4294967232  ;;  %v527_v0 = vmov 0   ;;  %v189_v1 = vld [vmem:[%s742_s1] sm:$0xf]  ;;  %vm179_vm0 = vcmask 1043456   ;;  %s310_s24 = sshll.u32 %s512_s13, 1 }
  0x3f   : > { %393 = vset.pattern.permute.xlu0 %v527_v0  ;;  %v177_v2 = vld [vmem:[%s156_s4] sm:$0xf]  ;;  %s210_s21 = sadd.s32 %s508_s12, %s310_s24  ;;  %s176_s5 = scalar_lea.vmem [#allocation5], %s307_s23 }
  0x40   : > { %193 = vperm.xlu0 %393, %v189_v1   ;;  %v178_v3 = vmul.f32 %v177_v2, %v177_v2  ;;  %s311_s26 = sshll.u32 %s210_s21, 6  ;;  %s214_s6 = sshll.u32 %s176_s5, 4  ;;  %s689_s6 = int_to_ptr.vmem [resolvable:$true] %s214_s6 }
  0x41   : > { %s687_s17 = scalar_lea.hbm %s743_s2, %s311_s26  ;;  %s199_s13 = scalar_lea.sflag [#allocation4], %s671_s27 }
  0x42   : > { %v180_v4 = vsel %vm179_vm0, %v178_v3, 0.0  ;;  %s426_s18 = scalar_lea.vmem %s689_s6, 64  ;;  %p752_p9 = scmp.ne.s32.totalorder %s747_s25, 0 }
  0x43   : > { %v181_v5 = vrot.slane %v180_v4, 4  ;;  %p427_p8 = scmp.ne.s32.totalorder %s689_s6, %s426_s18  ;;  %s528_s12 = smov [#allocation5]  }
  0x44   : > { %s430_s23 = sshll.u32 %s528_s12, 4  ;;  %s431_s23 = int_to_ptr.vmem [resolvable:$false] %s430_s23 }
  0x45   : > { %v182_v6 = vadd.f32 %v181_v5, %v180_v4  ;;  %p428_p12 = pnand %p427_p8, %p752_p9  ;;  %s432_s3 = scalar_lea.vmem %s431_s23, 128 }
  0x46   : > { %p433_p7 = scmp.lt.s32.totalorder %s689_s6, %s431_s23  ;;  %p434_p13 = scmp.lt.s32.totalorder %s432_s3, %s426_s18 }
  0x47   : > { %v183_v7 = vrot.slane %v182_v6, 2  ;;  %p429_p0 = pneg %p428_p12 }
  0x48   : > { %p435_p4 = por %p434_p13, %p433_p7 }
  0x49   : > { %v184_v8 = vadd.f32 %v183_v7, %v182_v6 }
  0x4a   : > { %p436_p6 = pnand %p435_p4, %p429_p0 }
  0x4b   : > { %v185_v9 = vrot.slane %v184_v8, 1 }
  0x4d   : > { %v186_v10 = vadd.f32 %v185_v9, %v184_v8 }
  0x4f   : > { %v187_v11 = vmax.f32 %v186_v10, 1e-24 }
  0x51   : > { %394 = vrsqrt.f32 %v187_v11 }
  0x5b   : > { %v395_v12 = vpop.eup %394 }
  0x5c   : > { %v190_v13 = vmul.f32 %v395_v12, %v177_v2 }
  0xbf   : > { %v194_v14 = vpop.permute.xlu0 %193 }
  0xc0   : > { %v196_v15 = vmul.f32 %v194_v14, %v190_v13 }
  0xc2   : > { %197 = vst [vmem:[%s176_s5] sm:$0xf] %v196_v15 }
  0xc3   : > { %439 = shalt.err (!%p436_p6)
}
  0xc4   : > { %s440_s27 = scalar_lea.hbm %s687_s17, 64  ;;  %s444_s22 = scalar_lea.hbm %s743_s2, 256 }
  0xc5   : > { %p441_p3 = scmp.ne.s32.totalorder %s687_s17, %s440_s27  ;;  %p445_p1 = scmp.lt.u32.totalorder %s687_s17, %s743_s2 }
  0xc6   : > { %p446_p2 = scmp.lt.u32.totalorder %s444_s22, %s440_s27  ;;  %p448_p8 = scmp.lt.u32.totalorder %s440_s27, %s687_s17 }
  0xc7   : > { %p442_p10 = pnand %p441_p3, %p752_p9 }
  0xc8   : > { %p447_p5 = por %p446_p2, %p445_p1 }
  0xc9   : > { %p443_p11 = pneg %p442_p10 }
  0xca   : > { %p449_p12 = por %p448_p8, %p447_p5 }
  0xcc   : > { %p450_p0 = pnand %p449_p12, %p443_p11 }
  0xce   : > { %453 = shalt.err (!%p450_p0)
}
  0xcf   : > { %316 = dma.vmem_to_hbm [thread:$0]  (%p752_p9), %s689_s6, 64, %s687_s17, %s199_s13  }
  0xd0 PF: > { %p327_p7 = scmp.ge.s32.totalorder %s524_s16, 2  ;;  %s226_s26 = sand.u32 1, %s496_s9  }
  0xd1   : > { %p753_p13 = scmp.ne.s32.totalorder %s748_s28, 0  ;;  %s227_s5 = scalar_lea.sflag [#allocation4], %s226_s26 }
  0xd3   : > { %p323_p4 = pnand %p327_p7, %p753_p13 }
  0xd5   : > { %491 = dma.done.wait (!%p323_p4), %s227_s5, 64  }
  0xd6   : > { %493 = vsyncadd (!%p323_p4), %s227_s5, 4294967232  ;;  %s18_s16 = sadd.s32 1, %s524_s16   ;;  %s754_s9 = smov %s500_s10 }
  0xd7   : > { %p15_p6 = scmp.ge.s32.totalorder %s18_s16, 6   ;;  %s755_s10 = smov %s504_s11 }
  0xd8   : > { %s756_s11 = smov %s622_s30  ;;  %s757_s12 = smov %s516_s14 }
  0xd9   : > { %s758_s13 = smov %s520_s15  ;;  %s759_s14 = smov %s762_s19 }
  0xda   : > { %s760_s15 = smov %s766_s20  ;;  %17 = sbr.rel (!%p15_p6) target bundleno = 7 (0x7), region = 73 }
  0xe1   :  { %232 = vsyncpa [#allocation3], 1 }
  0xe2   :  { %234 = vsyncpa [#allocation3 + $0x1], 1 }
  0xe3   :  { %235 = vsyncpa [#allocation4], 1 }
  0xe4   :  { %237 = vsyncpa [#allocation4 + $0x1], 1 }

</bundles_post_ra>
